<compile_context>
chip_gen: v7x
topology: tpu7x:2x2x1
jax: 0.10.0
libtpu: 0.0.40
codegen_flags: <defaults>
</compile_context>

<pallas_src>
import jax
import jax.numpy as jnp
from jax.experimental import pallas as pl
from jax.experimental.pallas import tpu as pltpu


def _round_up(n, m):
    return ((n + m - 1) // m) * m


def _mlp_kernel(x_ref, w1_ref, b1_ref, w2_ref, b2_ref, o_ref):
    # Two small MXU matmuls (f32 accumulation) + VPU bias-add / ReLU on the
    # whole VMEM tile. Output tile is narrow (10 lanes) -- writeback-optimal.
    x = x_ref[...]
    h = jnp.dot(x, w1_ref[...],
                preferred_element_type=jnp.float32,
                precision=jax.lax.Precision.HIGHEST) + b1_ref[...]
    h = jnp.maximum(h, 0.0)
    y = jnp.dot(h, w2_ref[...],
                preferred_element_type=jnp.float32,
                precision=jax.lax.Precision.HIGHEST) + b2_ref[...]
    o_ref[...] = y.astype(o_ref.dtype)


# Below this batch size a single grid step is used (block == full batch dim,
# always a legal block shape). Above it the grid gets >= 2 steps so v7x's two
# TensorCores both receive work.
_SPLIT_THRESHOLD = 2048


def _pick_tile(B, tile_b_max):
    if B <= _SPLIT_THRESHOLD:
        # One block covering the whole batch; block dim == array dim is legal
        # even when B is not a multiple of 8.
        return B
    # >= 2 grid steps; tile is a multiple of 8 (sublane rule), the ragged last
    # block (if any) is masked by the Pallas pipeline (OOB reads are garbage on
    # rows whose outputs are never written back).
    return min(tile_b_max, _round_up(pl.cdiv(B, 2), 8))


def tiny_diffusion_forward(x, t, params, *, tile_b=4096):
    """x: (B, 10) float32, t: ignored (as in the PyTorch module)."""
    del t  # unused by the reference module's forward
    w1, b1, w2, b2 = params
    B, d_in = x.shape
    d_hidden = w1.shape[1]
    d_out = w2.shape[1]

    tile = _pick_tile(B, tile_b)
    grid = (pl.cdiv(B, tile),)

    return pl.pallas_call(
        _mlp_kernel,
        out_shape=jax.ShapeDtypeStruct((B, d_out), x.dtype),
        grid=grid,
        in_specs=[
            pl.BlockSpec((tile, d_in), lambda i: (i, 0)),       # x: tiled over B
            pl.BlockSpec((d_in, d_hidden), lambda i: (0, 0)),   # W1: VMEM-resident
            pl.BlockSpec((1, d_hidden), lambda i: (0, 0)),      # b1: resident
            pl.BlockSpec((d_hidden, d_out), lambda i: (0, 0)),  # W2: resident
            pl.BlockSpec((1, d_out), lambda i: (0, 0)),         # b2: resident
        ],
        out_specs=pl.BlockSpec((tile, d_out), lambda i: (i, 0)),
        compiler_params=pltpu.CompilerParams(
            dimension_semantics=("parallel",),
        ),
    )(x, w1, b1, w2, b2)


def init_params(key, d_in=10, d_hidden=32, d_out=10, dtype=jnp.float32):
    """Deterministic init matching nn.Linear shapes.

    Weights are stored (D_in, D_out) so the kernel computes x @ W + b directly
    (PyTorch nn.Linear stores weight as (out, in); we pre-transpose).
    """
    k1, k2, k3, k4 = jax.random.split(key, 4)
    lim1 = 1.0 / jnp.sqrt(d_in)
    lim2 = 1.0 / jnp.sqrt(d_hidden)
    w1 = jax.random.uniform(k1, (d_in, d_hidden), dtype, -lim1, lim1)
    b1 = jax.random.uniform(k2, (1, d_hidden), dtype, -lim1, lim1)
    w2 = jax.random.uniform(k3, (d_hidden, d_out), dtype, -lim2, lim2)
    b2 = jax.random.uniform(k4, (1, d_out), dtype, -lim2, lim2)
    return w1, b1, w2, b2


def reference_forward(x, params):
    w1, b1, w2, b2 = params
    h = jnp.maximum(x @ w1 + b1, 0.0)
    return h @ w2 + b2


if __name__ == "__main__":
    key = jax.random.PRNGKey(0)
    kx, kt, kp, kx2 = jax.random.split(key, 4)

    D_IN = 10
    params = init_params(kp)

    # Small-batch path: single grid step, block == full (2, 10) array.
    B = 2
    x = jax.random.normal(kx, (B, D_IN), jnp.float32)
    t = jax.random.randint(kt, (B,), 0, 1000)  # ignored, like the torch module
    out = jax.block_until_ready(tiny_diffusion_forward(x, t, params))
    ref = reference_forward(x, params)
    assert out.shape == (B, 10), out.shape
    assert jnp.allclose(out, ref, atol=1e-5, rtol=1e-5), "mismatch vs reference (B=2)"

    # Larger batch exercising the >=2-step parallel grid and a ragged last block
    # (B=2050 -> tile=1032, grid=2, last block partially out of bounds).
    B2 = 2050
    x2 = jax.random.normal(kx2, (B2, D_IN), jnp.float32)
    out2 = jax.block_until_ready(tiny_diffusion_forward(x2, None, params))
    ref2 = reference_forward(x2, params)
    assert out2.shape == (B2, 10), out2.shape
    assert jnp.allclose(out2, ref2, atol=1e-5, rtol=1e-5), "mismatch vs reference (B=2050)"

    print("KERNEL_OK")
</pallas_src>

<mosaic_0001>
module attributes {stable_mosaic.version = 11 : i64} {
  func.func @_mlp_kernel(%arg0: i32, %arg1: memref<2x10xf32, #tpu.memory_space<vmem>>, %arg2: memref<10x32xf32, #tpu.memory_space<vmem>>, %arg3: memref<1x32xf32, #tpu.memory_space<vmem>>, %arg4: memref<32x10xf32, #tpu.memory_space<vmem>>, %arg5: memref<1x10xf32, #tpu.memory_space<vmem>>, %arg6: memref<2x10xf32, #tpu.memory_space<vmem>>) attributes {dimension_semantics = [#tpu.dimension_semantics<parallel>], iteration_bounds = array<i64: 1>, scalar_prefetch = 0 : i64, scratch_operands = 0 : i64, tpu.core_type = #tpu.core_type<tc>, window_params = [{transform_indices = @transform_0, window_bounds = array<i64: 2, 10>}, {pipeline_mode = #tpu.pipeline_mode<synchronous>, transform_indices = @transform_1, window_bounds = array<i64: 10, 32>}, {pipeline_mode = #tpu.pipeline_mode<synchronous>, transform_indices = @transform_2, window_bounds = array<i64: 1, 32>}, {pipeline_mode = #tpu.pipeline_mode<synchronous>, transform_indices = @transform_3, window_bounds = array<i64: 32, 10>}, {pipeline_mode = #tpu.pipeline_mode<synchronous>, transform_indices = @transform_4, window_bounds = array<i64: 1, 10>}, {transform_indices = @transform_5, window_bounds = array<i64: 2, 10>}]} {
    %c0 = arith.constant 0 : index
    %c0_0 = arith.constant 0 : index
    %0 = vector.load %arg1[%c0, %c0_0] : memref<2x10xf32, #tpu.memory_space<vmem>>, vector<2x10xf32>
    %c0_1 = arith.constant 0 : index
    %c0_2 = arith.constant 0 : index
    %1 = vector.load %arg2[%c0_1, %c0_2] : memref<10x32xf32, #tpu.memory_space<vmem>>, vector<10x32xf32>
    %cst = arith.constant dense<0.000000e+00> : vector<2x32xf32>
    %2 = tpu.matmul %0, %1, %cst {dimension_numbers = #tpu.dot_dimension_numbers<[1], [0], [0], [1], [0, 0, 1, 1], [], []>, precision = #tpu.contract_precision<fp32>} : vector<2x10xf32>, vector<10x32xf32>, vector<2x32xf32> -> vector<2x32xf32>
    %c0_3 = arith.constant 0 : index
    %c0_4 = arith.constant 0 : index
    %3 = vector.load %arg3[%c0_3, %c0_4] : memref<1x32xf32, #tpu.memory_space<vmem>>, vector<1x32xf32>
    %4 = vector.broadcast %3 : vector<1x32xf32> to vector<2x32xf32>
    %5 = arith.addf %2, %4 : vector<2x32xf32>
    %cst_5 = arith.constant 0.000000e+00 : f32
    %6 = vector.broadcast %cst_5 : f32 to vector<2x32xf32>
    %7 = arith.maximumf %5, %6 : vector<2x32xf32>
    %c0_6 = arith.constant 0 : index
    %c0_7 = arith.constant 0 : index
    %8 = vector.load %arg4[%c0_6, %c0_7] : memref<32x10xf32, #tpu.memory_space<vmem>>, vector<32x10xf32>
    %cst_8 = arith.constant dense<0.000000e+00> : vector<2x10xf32>
    %9 = tpu.matmul %7, %8, %cst_8 {dimension_numbers = #tpu.dot_dimension_numbers<[1], [0], [0], [1], [0, 0, 1, 1], [], []>, precision = #tpu.contract_precision<fp32>} : vector<2x32xf32>, vector<32x10xf32>, vector<2x10xf32> -> vector<2x10xf32>
    %c0_9 = arith.constant 0 : index
    %c0_10 = arith.constant 0 : index
    %10 = vector.load %arg5[%c0_9, %c0_10] : memref<1x10xf32, #tpu.memory_space<vmem>>, vector<1x10xf32>
    %11 = vector.broadcast %10 : vector<1x10xf32> to vector<2x10xf32>
    %12 = arith.addf %9, %11 : vector<2x10xf32>
    %c0_11 = arith.constant 0 : index
    %c0_12 = arith.constant 0 : index
    %13 = vector.load %arg6[%c0_11, %c0_12] : memref<2x10xf32, #tpu.memory_space<vmem>>, vector<2x10xf32>
    tpu.vector_store %arg6[%c0_11, %c0_12], %12 {strides = array<i32>} : memref<2x10xf32, #tpu.memory_space<vmem>>, vector<2x10xf32>,
    return
  }
  func.func @transform_0(%arg0: i32) -> (i32, i32) {
    %c0_i32 = arith.constant 0 : i32
    %c0_i32_0 = arith.constant 0 : i32
    return %arg0, %c0_i32 : i32, i32
  }
  func.func @transform_1(%arg0: i32) -> (i32, i32) {
    %c0_i32 = arith.constant 0 : i32
    %c0_i32_0 = arith.constant 0 : i32
    %c0_i32_1 = arith.constant 0 : i32
    return %c0_i32, %c0_i32_0 : i32, i32
  }
  func.func @transform_2(%arg0: i32) -> (i32, i32) {
    %c0_i32 = arith.constant 0 : i32
    %c0_i32_0 = arith.constant 0 : i32
    %c0_i32_1 = arith.constant 0 : i32
    return %c0_i32, %c0_i32_0 : i32, i32
  }
  func.func @transform_3(%arg0: i32) -> (i32, i32) {
    %c0_i32 = arith.constant 0 : i32
    %c0_i32_0 = arith.constant 0 : i32
    %c0_i32_1 = arith.constant 0 : i32
    return %c0_i32, %c0_i32_0 : i32, i32
  }
  func.func @transform_4(%arg0: i32) -> (i32, i32) {
    %c0_i32 = arith.constant 0 : i32
    %c0_i32_0 = arith.constant 0 : i32
    %c0_i32_1 = arith.constant 0 : i32
    return %c0_i32, %c0_i32_0 : i32, i32
  }
  func.func @transform_5(%arg0: i32) -> (i32, i32) {
    %c0_i32 = arith.constant 0 : i32
    %c0_i32_0 = arith.constant 0 : i32
    return %arg0, %c0_i32 : i32, i32
  }
}

</mosaic_0001>

<bundles_post_ra>
// kernel: tpu_custom_call.1
= control target key start
LH: loop header
LB: loop body
LE: loop exit
PB: predicated region body
PF: predicated region fallthrough
CT: control target
= control target key end

     0   :  { %vm35_vm0 = vcmask 1041408   ;;  %v1276_v2 = vmov 0.0|0.0   ;;  %vm31_vm1 = vcmask 80896   ;;  %vm1277_vm2 = vmmov 0   ;;  %s1391_s0 = inlined_call_operand.vmem [shape: f32[2,10], index: 0, kind: input, shape index: {}]   ;;  %s1392_s1 = inlined_call_operand.vmem [shape: f32[10,32], index: 1, kind: input, shape index: {}]   ;;  %s1393_s2 = inlined_call_operand.vmem [shape: f32[1,32], index: 2, kind: input, shape index: {}]   ;;  %s1394_s3 = inlined_call_operand.vmem [shape: f32[32,10], index: 3, kind: input, shape index: {}]   ;;  %s1395_s4 = inlined_call_operand.vmem [shape: f32[1,10], index: 4, kind: input, shape index: {}]   ;;  %s1396_s5 = inlined_call_operand.hbm [shape: f32[2,10], index: 5, kind: output, shape index: {}]  }
   0x1   :  { %v22_v0 = vld [vmem:[%s1392_s1] sm:$0xff]  ;;  %v23_v1 = vld [vmem:[%s1392_s1 + $0x8] sm:$0x3]  ;;  %1173 = vmatprep.subr.bf16.mxu0 %v1276_v2  ;;  %1197 = vmatprep.subr.bf16.mxu1 %v1276_v2  ;;  %v1278_v7 = vmov 0.0  }
   0x2   :  { %v37_v3 = vsel %vm35_vm0, %v23_v1, 0  ;;  %v40_v4 = vand.u32 4294901760, %v22_v0  ;;  %v21_v5 = vld [vmem:[%s1391_s0] sm:$0x3]  ;;  %1069 = vmatprep.mubr.msk.f32.mxu0 %vm1277_vm2, %v1278_v7  ;;  %1126 = vmatprep.mubr.msk.f32.mxu1 %vm1277_vm2, %v1278_v7 }
   0x3   :  { %v43_v6 = vand.u32 4294901760, %v37_v3  ;;  %v33_v8 = vsel %vm31_vm1, %v21_v5, 0 }
   0x4   :  { %10 = vsyncpa [#allocation3], 0  ;;  %v118_v9 = vsub.f32 %v22_v0, %v40_v4  ;;  %v106_v10 = vand.u32 4294901760, %v33_v8  ;;  %v499_v26 = vld [vmem:[%s1394_s3] sm:$0xff]  ;;  %v500_v27 = vld [vmem:[%s1394_s3 + $0x8] sm:$0xff]  ;;  %vm510_vm3 = vcmask 261120  }
   0x5   :  { %v1174_v11 = vpack.c.bf16 %v43_v6, %v40_v4  ;;  %v125_v12 = vsub.f32 %v37_v3, %v43_v6  ;;  %v515_v28 = vand.u32 4294901760, %v499_v26  ;;  %v518_v29 = vand.u32 4294901760, %v500_v27  ;;  %v501_v32 = vld [vmem:[%s1394_s3 + $0x10] sm:$0xff]  ;;  %v502_v33 = vld [vmem:[%s1394_s3 + $0x18] sm:$0xff]  ;;  %v1015_v58 = vld [vmem:[%s1393_s2] ss:$0 sm:$0xff] }
   0x6   :  { %v107_v13 = vsub.f32 %v33_v8, %v106_v10  ;;  %v119_v14 = vand.u32 4294901760, %v118_v9  ;;  %v521_v36 = vand.u32 4294901760, %v501_v32  ;;  %v524_v37 = vand.u32 4294901760, %v502_v33  ;;  %s1279_s7 = smov [#allocation2]  }
   0x7   :  { %1175 = vmatpush3.bf16.msra.mxu0 %v1174_v11  ;;  %v126_v15 = vand.u32 4294901760, %v125_v12  ;;  %v1180_v24 = vpack.c.bf16 %v125_v12, %v118_v9  ;;  %v595_v30 = vsub.f32 %v499_v26, %v515_v28  ;;  %v602_v31 = vsub.f32 %v500_v27, %v518_v29  ;;  %s1007_s8 = sshll.u32 %s1279_s7, 4  ;;  %s1008_s8 = int_to_ptr.vmem [resolvable:$true] %s1007_s8 }
   0x8   :  { %v108_v16 = vand.u32 4294901760, %v107_v13  ;;  %1176 = vmatprep.subr.bf16.mxu0 %v1276_v2  ;;  %v120_v17 = vsub.f32 %v118_v9, %v119_v14  ;;  %v609_v40 = vsub.f32 %v501_v32, %v521_v36  ;;  %v616_v41 = vsub.f32 %v502_v33, %v524_v37  ;;  %v1016_v9 = vld [vmem:[%s1395_s4] ss:$0 sm:$0xff]  ;;  %s1252_s9 = scalar_lea.vmem %s1008_s8, 32  ;;  %p1257_p1 = scmp.lt.s32.totalorder %s1008_s8, %s1008_s8 }
   0x9   :  { %v127_v18 = vsub.f32 %v125_v12, %v126_v15  ;;  %v1186_v25 = vpack.c.bf16 %v126_v15, %v119_v14  ;;  %v596_v34 = vand.u32 4294901760, %v595_v30  ;;  %v603_v35 = vand.u32 4294901760, %v602_v31  ;;  %p1253_p0 = scmp.ne.s32.totalorder %s1008_s8, %s1252_s9  ;;  %p1258_p2 = scmp.lt.s32.totalorder %s1252_s9, %s1252_s9 }
   0xa   :  { %v109_v19 = vsub.f32 %v107_v13, %v108_v16  ;;  %v121_v20 = vand.u32 4294901760, %v120_v17  ;;  %v610_v44 = vand.u32 4294901760, %v609_v40  ;;  %v617_v45 = vand.u32 4294901760, %v616_v41 }
   0xb   :  { %v128_v21 = vand.u32 4294901760, %v127_v18  ;;  %v597_v38 = vsub.f32 %v595_v30, %v596_v34  ;;  %v604_v39 = vsub.f32 %v602_v31, %v603_v35  ;;  %v1192_v52 = vpack.c.bf16 %v518_v29, %v515_v28  ;;  %p1259_p3 = por %p1258_p2, %p1257_p1 }
   0xc   :  { %v110_v22 = vand.u32 4294901760, %v109_v19  ;;  %v611_v47 = vsub.f32 %v609_v40, %v610_v44  ;;  %v618_v48 = vsub.f32 %v616_v41, %v617_v45  ;;  %v1204_v53 = vpack.c.bf16 %v602_v31, %v595_v30 }
   0xd   :  { %v1177_v23 = vpack.c.bf16 %v128_v21, %v121_v20  ;;  %v598_v42 = vand.u32 4294901760, %v597_v38  ;;  %v605_v43 = vand.u32 4294901760, %v604_v39  ;;  %v1195_v54 = vpack.c.bf16 %v524_v37, %v521_v36  ;;  %p1260_p4 = pnand %p1259_p3, %p1253_p0 }
   0xe   :  { %1070 = vmatmul.mubr.f32.vlgmr.msra.gmra.mrb[0].mxu0 %v110_v22  ;;  %v612_v49 = vand.u32 4294901760, %v611_v47  ;;  %v619_v50 = vand.u32 4294901760, %v618_v48  ;;  %v1207_v55 = vpack.c.bf16 %v616_v41, %v609_v40  ;;  %v1216_v56 = vpack.c.bf16 %v603_v35, %v596_v34 }
   0xf   :  { %1178 = vmatpush3.bf16.msra.mxu0 %v1177_v23  ;;  %1076 = vmatprep.mubr.msk.f32.mxu0 %vm1277_vm2, %v1278_v7  ;;  %v1198_v46 = vpack.c.bf16 %v605_v43, %v598_v42  ;;  %v1219_v57 = vpack.c.bf16 %v617_v45, %v610_v44  ;;  %vm999_vm4 = vcmask 74752  }
  0x10   :  { %1179 = vmatprep.subr.bf16.mxu0 %v1276_v2  ;;  %v1201_v51 = vpack.c.bf16 %v619_v50, %v612_v49 }
  0x11   :  { %1199 = vmatpush3.bf16.msra.mxu1 %v1198_v46 }
  0x12   :  { %1200 = vmatprep.subr.bf16.mxu1 %v1276_v2 }
  0x15   :  { %1202 = vmatpush3.bf16.msra.mxu1 %v1201_v51 }
  0x16   :  { %1077 = vmatmul.mubr.f32.vlgmr.msra.gmra.mrb[0].mxu0 %v106_v10  ;;  %1203 = vmatprep.subr.bf16.mxu1 %v1276_v2 }
  0x17   :  { %1181 = vmatpush3.bf16.msra.mxu0 %v1180_v24  ;;  %1083 = vmatprep.mubr.msk.f32.mxu0 %vm1277_vm2, %v1278_v7 }
  0x18   :  { %1182 = vmatprep.subr.bf16.mxu0 %v1276_v2 }
  0x1e   :  { %1084 = vmatmul.mubr.f32.vlgmr.msra.gmra.mrb[0].mxu0 %v107_v13 }
  0x1f   :  { %1184 = vmatpush3.bf16.msra.mxu0 %v1174_v11  ;;  %1090 = vmatprep.mubr.msk.f32.mxu0 %vm1277_vm2, %v1278_v7 }
  0x20   :  { %1185 = vmatprep.subr.bf16.mxu0 %v1276_v2 }
  0x26   :  { %1091 = vmatmul.mubr.f32.vlgmr.msra.gmra.mrb[0].mxu0 %v108_v16 }
  0x27   :  { %1187 = vmatpush3.bf16.msra.mxu0 %v1186_v25  ;;  %1097 = vmatprep.mubr.msk.f32.mxu0 %vm1277_vm2, %v1278_v7 }
  0x28   :  { %1188 = vmatprep.subr.bf16.mxu0 %v1276_v2 }
  0x2e   :  { %1098 = vmatmul.mubr.f32.vlgmr.msra.gmra.mrb[0].mxu0 %v106_v10 }
  0x2f   :  { %1190 = vmatpush3.bf16.msra.mxu0 %v1174_v11  ;;  %1104 = vmatprep.mubr.msk.f32.mxu0 %vm1277_vm2, %v1278_v7 }
  0x30   :  { %1191 = vmatprep.subr.bf16.mxu0 %v1276_v2 }
  0x36   :  { %1105 = vmatmul.mubr.f32.vlgmr.msra.gmra.mrb[0].mxu0 %v106_v10 }
  0x37   :  { %1115 = vmatprep.mubr.msk.f32.mxu0 %vm1277_vm2, %v1278_v7  ;;  %1193 = vmatpush3.bf16.msra.mxu0 %v1192_v52 }
  0x38   :  { %1194 = vmatprep.subr.bf16.mxu0 %v1276_v2 }
  0x3b   :  { %1196 = vmatpush3.bf16.msra.mxu0 %v1195_v54 }
 0x109   :  { %v494_v59 = vpop.f32.mrb[0].mxu0 }
 0x10a   :  { %v1227_v60 = vadd.f32 %v1015_v58, %v494_v59  ;;  %v1106_v61 = vpop.f32.mrb[1].mxu0 }
 0x10c   :  { %v498_v62 = vmax.f32 %v1227_v60, 0.0 }
 0x10e   :  { %v512_v63 = vsel %vm510_vm3, %v498_v62, 0 }
 0x10f   :  { %v583_v0 = vand.u32 4294901760, %v512_v63 }
 0x111   :  { %v584_v1 = vsub.f32 %v512_v63, %v583_v0  ;;  %1127 = vmatmul.mubr.f32.vlgmr.msra.gmra.mrb[0].mxu1 %v583_v0 }
 0x112   :  { %1205 = vmatpush3.bf16.msra.mxu1 %v1204_v53  ;;  %1137 = vmatprep.mubr.msk.f32.mxu1 %vm1277_vm2, %v1278_v7 }
 0x113   :  { %v585_v3 = vand.u32 4294901760, %v584_v1  ;;  %1206 = vmatprep.subr.bf16.mxu1 %v1276_v2 }
 0x115   :  { %v586_v4 = vsub.f32 %v584_v1, %v585_v3 }
 0x116   :  { %1208 = vmatpush3.bf16.msra.mxu1 %v1207_v55 }
 0x117   :  { %v587_v5 = vand.u32 4294901760, %v586_v4  ;;  %1209 = vmatprep.subr.bf16.mxu1 %v1276_v2 }
 0x119   :  { %1116 = vmatmul.mubr.f32.vlgmr.msra.gmra.mrb[2].mxu0 %v587_v5  ;;  %1138 = vmatmul.mubr.f32.vlgmr.msra.gmra.mrb[0].mxu1 %v584_v1 }
 0x11a   :  { %1211 = vmatpush3.bf16.msra.mxu1 %v1192_v52  ;;  %1148 = vmatprep.mubr.msk.f32.mxu1 %vm1277_vm2, %v1278_v7 }
 0x11b   :  { %1212 = vmatprep.subr.bf16.mxu1 %v1276_v2 }
 0x11e   :  { %1214 = vmatpush3.bf16.msra.mxu1 %v1195_v54 }
 0x11f   :  { %1215 = vmatprep.subr.bf16.mxu1 %v1276_v2 }
 0x121   :  { %1149 = vmatmul.mubr.f32.vlgmr.msra.gmra.mrb[0].mxu1 %v585_v3 }
 0x122   :  { %1217 = vmatpush3.bf16.msra.mxu1 %v1216_v56  ;;  %1159 = vmatprep.mubr.msk.f32.mxu1 %vm1277_vm2, %v1278_v7 }
 0x123   :  { %1218 = vmatprep.subr.bf16.mxu1 %v1276_v2 }
 0x126   :  { %1220 = vmatpush3.bf16.msra.mxu1 %v1219_v57 }
 0x127   :  { %1221 = vmatprep.subr.bf16.mxu1 %v1276_v2 }
 0x129   :  { %1160 = vmatmul.mubr.f32.vlgmr.msra.gmra.mrb[0].mxu1 %v583_v0 }
 0x12a   :  { %1223 = vmatpush3.bf16.msra.mxu1 %v1192_v52  ;;  %1170 = vmatprep.mubr.msk.f32.mxu1 %vm1277_vm2, %v1278_v7 }
 0x12b   :  { %1224 = vmatprep.subr.bf16.mxu1 %v1276_v2 }
 0x12e   :  { %1226 = vmatpush3.bf16.msra.mxu1 %v1195_v54 }
 0x131   :  { %1171 = vmatmul.mubr.f32.vlgmr.msra.gmra.mrb[0].mxu1 %v583_v0 }
 0x1ec   :  { %v589_v6 = vpop.f32.mrb[2].mxu0 }
 0x1ed   :  { %v1117_v8 = vpop.f32.mrb[3].mxu0  ;;  %v590_v10 = vadd.f32 %v1016_v9, %v589_v6 }
 0x204   :  { %v995_v11 = vpop.f32.mrb[0].mxu1 }
 0x205   :  { %v1229_v12 = vadd.f32 %v995_v11, %v590_v10  ;;  %v1172_v13 = vpop.f32.mrb[1].mxu1 }
 0x207   :  { %1000 = vst.msk [vmem:[#allocation2] sm:$0x3] %vm999_vm4, %v1229_v12 }
 0x208   :  { %1263 = shalt.err (!%p1260_p4)
}
 0x209   :  { %s1264_s4 = scalar_lea.hbm %s1396_s5, 32 }
 0x20a   :  { %p1265_p5 = scmp.ne.s32.totalorder %s1396_s5, %s1264_s4  ;;  %p1268_p6 = scmp.lt.u32.totalorder %s1264_s4, %s1396_s5 }
 0x20c   :  { %p1270_p7 = pnand %p1268_p6, %p1265_p5 }
 0x20e   :  { %1273 = shalt.err (!%p1270_p7)
}
 0x20f   :  { %1010 = dma.vmem_to_hbm [thread:$0]  %s1008_s8, 32, %s1396_s5, [#allocation3]  }
 0x210   :  { %1274 = dma.done.wait [#allocation3], 32  }
 0x211   :  { %1275 = vsyncadd [#allocation3], 4294967264 }
 0x212   :  { %1014 = vsyncpa [#allocation3], 1 }

</bundles_post_ra>
